<compile_context>
chip_gen: v7x
topology: tpu7x:2x2x1
jax: 0.10.0
libtpu: 0.0.40
codegen_flags: <defaults>
</compile_context>

<pallas_src>
import functools
import math

import numpy as np

import jax
import jax.numpy as jnp
from jax.experimental import pallas as pl
from jax.experimental.pallas import tpu as pltpu

_N_TERMS = 5            # Quantization(n=5)
_LANES = 128
_MAX_BLOCK_ROWS = 4096  # 4096 * 128 * 4 B = 2 MiB f32 per block
_MIN_BLOCK_ROWS = 512   # 512-row tiles already ~85% of HBM roofline
_TARGET_STEPS = 8       # enough grid steps for pipelining + both v7x TCs


def _fit_sin2pi_coeffs(num_terms: int = 5) -> tuple:
    """Near-minimax fit of sin(2*pi*r) ~= r * (a0 + a1 r^2 + ... ) on [-0.5, 0.5].

    Least squares at Chebyshev-distributed nodes in u = r^2; max error of the
    degree-9 odd polynomial is ~3e-6, i.e. <1e-8 in output space after the
    1/(pi*i*255) weighting.
    """
    n_nodes = 2048
    k = np.arange(1, n_nodes + 1)
    u = 0.125 * (1.0 - np.cos((2 * k - 1) * np.pi / (2 * n_nodes)))  # in (0, 0.25]
    r = np.sqrt(u)
    g = np.sin(2.0 * np.pi * r) / r
    vander = np.stack([u ** j for j in range(num_terms)], axis=1)
    coeffs, *_ = np.linalg.lstsq(vander, g, rcond=None)
    return tuple(float(c) for c in coeffs)


_SIN2PI_COEFFS = _fit_sin2pi_coeffs(5)


def _quantization_kernel(x_ref, o_ref, *, n_terms, sin_coeffs):
    x = x_ref[...].astype(jnp.float32)
    scaled = x * 255.0

    # Exact periodic reduction: sin(2*pi*i*scaled) == sin(2*pi*i*r) with
    # r = scaled - round(scaled) in [-0.5, 0.5] (exact for |scaled| < 2^23).
    r = scaled - jnp.floor(scaled + 0.5)

    # s1 = sin(2*pi*r): degree-9 odd polynomial evaluated directly in r.
    u = r * r
    p = sin_coeffs[-1]
    for c in reversed(sin_coeffs[:-1]):
        p = p * u + c
    s1 = p * r

    # c1 = cos(2*pi*r): magnitude via EUP sqrt (idle VLIW slot in this kernel),
    # sign flips at |r| == 0.25.  Clamp guards against |s1| > 1 poly overshoot.
    csq = jnp.sqrt(jnp.maximum(1.0 - s1 * s1, 0.0))
    c1 = jnp.where(jnp.abs(r) <= 0.25, csq, -csq)

    # Chebyshev recurrence: sin(k*t) = 2*cos(t)*sin((k-1)*t) - sin((k-2)*t).
    # Accumulate only the Fourier correction, with the /255 folded into the
    # trace-time weights -> no final vector divide.
    def weight(i):
        return ((-1.0) ** i) / (math.pi * i * 255.0)

    t2c = 2.0 * c1
    fsum = weight(1) * s1
    if n_terms >= 2:
        sk_prev, sk = s1, t2c * s1
        fsum = fsum + weight(2) * sk
        for i in range(3, n_terms + 1):
            sk, sk_prev = t2c * sk - sk_prev, sk
            fsum = fsum + weight(i) * sk

    o_ref[...] = (x + fsum).astype(o_ref.dtype)


def _choose_block_rows(rows: int, itemsize: int) -> int:
    # dtype-aware sublane alignment: f32 -> 8, bf16 -> 16, int8/fp8 -> 32.
    align = 8 * max(1, 4 // max(1, itemsize))
    if rows <= max(_MIN_BLOCK_ROWS, align):
        # Single block equal to the full array -> exempt from the (8,128) rule,
        # and per-step overhead is negligible at this size anyway.
        return rows
    target = pl.cdiv(rows, _TARGET_STEPS)
    br = min(max(target, _MIN_BLOCK_ROWS), _MAX_BLOCK_ROWS, rows)
    br = max((br // align) * align, align)
    return br


def _run_kernel_2d(x2d: jax.Array, n: int, out_dtype) -> jax.Array:
    rows, _ = x2d.shape
    br = _choose_block_rows(rows, jnp.dtype(out_dtype).itemsize)
    grid = (pl.cdiv(rows, br),)
    kernel = functools.partial(
        _quantization_kernel, n_terms=int(n), sin_coeffs=_SIN2PI_COEFFS
    )
    return pl.pallas_call(
        kernel,
        out_shape=jax.ShapeDtypeStruct((rows, _LANES), out_dtype),
        grid_spec=pltpu.PrefetchScalarGridSpec(
            num_scalar_prefetch=0,
            grid=grid,
            in_specs=[pl.BlockSpec((br, _LANES), lambda i: (i, 0))],
            out_specs=pl.BlockSpec((br, _LANES), lambda i: (i, 0)),
        ),
        compiler_params=pltpu.CompilerParams(
            dimension_semantics=("parallel",),
        ),
    )(x2d)


def quantization(inp: jax.Array, n: int = _N_TERMS) -> jax.Array:
    orig_shape = inp.shape
    orig_dtype = inp.dtype

    flat = inp.reshape(-1)  # free (contiguous)
    total = flat.shape[0]
    if total == 0:
        return inp

    main = (total // _LANES) * _LANES
    tail = total - main

    outs = []
    if main > 0:
        x_main = flat if tail == 0 else flat[:main]
        x2d = x_main.reshape(main // _LANES, _LANES)
        outs.append(_run_kernel_2d(x2d, n, orig_dtype).reshape(-1))
    if tail > 0:
        # Rare ragged case: the <128-element tail is computed in plain JAX,
        # avoiding a full extra HBM pad/slice pass over the whole tensor.
        outs.append(_reference(flat[main:], n).astype(orig_dtype))

    out = outs[0] if len(outs) == 1 else jnp.concatenate(outs)
    return out.reshape(orig_shape)


def _reference(inp: jax.Array, n: int = _N_TERMS) -> jax.Array:
    # Literal transcription of the PyTorch forward.
    x = inp.astype(jnp.float32)
    out = x * 255.0
    flag = -1.0
    for i in range(1, n + 1):
        out = out + flag / math.pi / i * jnp.sin(2.0 * i * math.pi * x * 255.0)
        flag = -flag
    return out / 255.0


if __name__ == "__main__":
    key = jax.random.PRNGKey(0)
    x = jax.random.uniform(key, (2, 4, 16, 16), dtype=jnp.float32)

    y = quantization(x)
    jax.block_until_ready(y)

    y_ref = _reference(x)
    assert y.shape == x.shape and y.dtype == x.dtype
    assert jnp.allclose(y, y_ref, atol=1e-4, rtol=1e-4), "mismatch vs reference"

    print("KERNEL_OK")
</pallas_src>

<mosaic_0001>
module attributes {stable_mosaic.version = 11 : i64} {
  func.func @_quantization_kernel(%arg0: i32, %arg1: memref<16x128xf32, #tpu.memory_space<vmem>>, %arg2: memref<16x128xf32, #tpu.memory_space<vmem>>) attributes {dimension_semantics = [#tpu.dimension_semantics<parallel>], iteration_bounds = array<i64: 1>, scalar_prefetch = 0 : i64, scratch_operands = 0 : i64, tpu.core_type = #tpu.core_type<tc>, window_params = [{transform_indices = @transform_0, window_bounds = array<i64: 16, 128>}, {transform_indices = @transform_1, window_bounds = array<i64: 16, 128>}]} {
    %c0 = arith.constant 0 : index
    %c0_0 = arith.constant 0 : index
    %0 = vector.load %arg1[%c0, %c0_0] : memref<16x128xf32, #tpu.memory_space<vmem>>, vector<16x128xf32>
    %cst = arith.constant 2.550000e+02 : f32
    %1 = vector.broadcast %cst : f32 to vector<16x128xf32>
    %2 = arith.mulf %0, %1 : vector<16x128xf32>
    %cst_1 = arith.constant 5.000000e-01 : f32
    %3 = vector.broadcast %cst_1 : f32 to vector<16x128xf32>
    %4 = arith.addf %2, %3 : vector<16x128xf32>
    %5 = math.floor %4 : vector<16x128xf32>
    %6 = arith.subf %2, %5 : vector<16x128xf32>
    %7 = arith.mulf %6, %6 : vector<16x128xf32>
    %cst_2 = arith.constant 33.5483551 : f32
    %8 = vector.broadcast %cst_2 : f32 to vector<16x128xf32>
    %9 = arith.mulf %8, %7 : vector<16x128xf32>
    %cst_3 = arith.constant -74.9094162 : f32
    %10 = vector.broadcast %cst_3 : f32 to vector<16x128xf32>
    %11 = arith.addf %9, %10 : vector<16x128xf32>
    %12 = arith.mulf %11, %7 : vector<16x128xf32>
    %cst_4 = arith.constant 81.4477081 : f32
    %13 = vector.broadcast %cst_4 : f32 to vector<16x128xf32>
    %14 = arith.addf %12, %13 : vector<16x128xf32>
    %15 = arith.mulf %14, %7 : vector<16x128xf32>
    %cst_5 = arith.constant -41.3368301 : f32
    %16 = vector.broadcast %cst_5 : f32 to vector<16x128xf32>
    %17 = arith.addf %15, %16 : vector<16x128xf32>
    %18 = arith.mulf %17, %7 : vector<16x128xf32>
    %cst_6 = arith.constant 6.28316116 : f32
    %19 = vector.broadcast %cst_6 : f32 to vector<16x128xf32>
    %20 = arith.addf %18, %19 : vector<16x128xf32>
    %21 = arith.mulf %20, %6 : vector<16x128xf32>
    %22 = arith.mulf %21, %21 : vector<16x128xf32>
    %cst_7 = arith.constant 1.000000e+00 : f32
    %23 = vector.broadcast %cst_7 : f32 to vector<16x128xf32>
    %24 = arith.subf %23, %22 : vector<16x128xf32>
    %cst_8 = arith.constant 0.000000e+00 : f32
    %25 = vector.broadcast %cst_8 : f32 to vector<16x128xf32>
    %26 = arith.maximumf %24, %25 : vector<16x128xf32>
    %27 = math.sqrt %26 : vector<16x128xf32>
    %28 = math.absf %6 : vector<16x128xf32>
    %cst_9 = arith.constant 2.500000e-01 : f32
    %29 = vector.broadcast %cst_9 : f32 to vector<16x128xf32>
    %30 = arith.cmpf ole, %28, %29 : vector<16x128xf32>
    %cst_10 = arith.constant 0.000000e+00 : f32
    %31 = vector.broadcast %cst_10 : f32 to vector<16x128xf32>
    %32 = arith.subf %31, %27 : vector<16x128xf32>
    %33 = arith.select %30, %27, %32 : vector<16x128xi1>, vector<16x128xf32>
    %cst_11 = arith.constant 2.000000e+00 : f32
    %34 = vector.broadcast %cst_11 : f32 to vector<16x128xf32>
    %35 = arith.mulf %34, %33 : vector<16x128xf32>
    %cst_12 = arith.constant -0.00124827411 : f32
    %36 = vector.broadcast %cst_12 : f32 to vector<16x128xf32>
    %37 = arith.mulf %36, %21 : vector<16x128xf32>
    %38 = arith.mulf %35, %21 : vector<16x128xf32>
    %cst_13 = arith.constant 6.24137057E-4 : f32
    %39 = vector.broadcast %cst_13 : f32 to vector<16x128xf32>
    %40 = arith.mulf %39, %38 : vector<16x128xf32>
    %41 = arith.addf %37, %40 : vector<16x128xf32>
    %42 = arith.mulf %35, %38 : vector<16x128xf32>
    %43 = arith.subf %42, %21 : vector<16x128xf32>
    %cst_14 = arith.constant -4.16091352E-4 : f32
    %44 = vector.broadcast %cst_14 : f32 to vector<16x128xf32>
    %45 = arith.mulf %44, %43 : vector<16x128xf32>
    %46 = arith.addf %41, %45 : vector<16x128xf32>
    %47 = arith.mulf %35, %43 : vector<16x128xf32>
    %48 = arith.subf %47, %38 : vector<16x128xf32>
    %cst_15 = arith.constant 3.12068529E-4 : f32
    %49 = vector.broadcast %cst_15 : f32 to vector<16x128xf32>
    %50 = arith.mulf %49, %48 : vector<16x128xf32>
    %51 = arith.addf %46, %50 : vector<16x128xf32>
    %52 = arith.mulf %35, %48 : vector<16x128xf32>
    %53 = arith.subf %52, %43 : vector<16x128xf32>
    %cst_16 = arith.constant -2.49654811E-4 : f32
    %54 = vector.broadcast %cst_16 : f32 to vector<16x128xf32>
    %55 = arith.mulf %54, %53 : vector<16x128xf32>
    %56 = arith.addf %51, %55 : vector<16x128xf32>
    %57 = arith.addf %0, %56 : vector<16x128xf32>
    %c0_17 = arith.constant 0 : index
    %c0_18 = arith.constant 0 : index
    %58 = vector.load %arg2[%c0_17, %c0_18] : memref<16x128xf32, #tpu.memory_space<vmem>>, vector<16x128xf32>
    tpu.vector_store %arg2[%c0_17, %c0_18], %57 {strides = array<i32>} : memref<16x128xf32, #tpu.memory_space<vmem>>, vector<16x128xf32>,
    return
  }
  func.func @transform_0(%arg0: i32) -> (i32, i32) {
    %c0_i32 = arith.constant 0 : i32
    %c0_i32_0 = arith.constant 0 : i32
    return %arg0, %c0_i32 : i32, i32
  }
  func.func @transform_1(%arg0: i32) -> (i32, i32) {
    %c0_i32 = arith.constant 0 : i32
    %c0_i32_0 = arith.constant 0 : i32
    return %arg0, %c0_i32 : i32, i32
  }
}

</mosaic_0001>

<bundles_post_ra>
// kernel: tpu_custom_call.1
= control target key start
LH: loop header
LB: loop body
LE: loop exit
PB: predicated region body
PF: predicated region fallthrough
CT: control target
= control target key end

     0   :  { %6 = vsyncpa [#allocation3], 0  ;;  %s244_s0 = inlined_call_operand.hbm [shape: f32[16,128], index: 0, kind: input, shape index: {}]   ;;  %s245_s1 = inlined_call_operand.hbm [shape: f32[16,128], index: 1, kind: output, shape index: {}]  }
   0x1   :  { %7 = vsyncpa [#allocation4], 0  ;;  %s192_s6 = smov [#allocation2]   ;;  %s144_s10 = scalar_lea.hbm %s244_s0, 256 }
   0x2   :  { %s13_s7 = sshll.u32 %s192_s6, 4  ;;  %p145_p0 = scmp.ne.s32.totalorder %s244_s0, %s144_s10  ;;  %s14_s7 = int_to_ptr.vmem [resolvable:$true] %s13_s7 }
   0x3   :  { %p148_p1 = scmp.lt.u32.totalorder %s144_s10, %s244_s0 }
   0x5   :  { %p150_p2 = pnand %p148_p1, %p145_p0 }
   0x7   :  { %153 = shalt.err (!%p150_p2)
}
   0x8   :  { %s154_s15 = scalar_lea.vmem %s14_s7, 256  ;;  %p159_p4 = scmp.lt.s32.totalorder %s14_s7, %s14_s7 }
   0x9   :  { %p155_p3 = scmp.ne.s32.totalorder %s14_s7, %s154_s15  ;;  %p160_p5 = scmp.lt.s32.totalorder %s154_s15, %s154_s15 }
   0xb   :  { %p161_p6 = por %p160_p5, %p159_p4 }
   0xd   :  { %p162_p7 = pnand %p161_p6, %p155_p3 }
   0xf   :  { %165 = shalt.err (!%p162_p7)
}
  0x10   :  { %s193_s16 = smov 128   ;;  %s194_s17 = smov 8  }
  0x11   :  { %19 = dma.hbm_to_vmem [thread:$0]  %s244_s0, 256, %s14_s7, [#allocation3], %s193_s16, %s193_s16, %s194_s17  }
  0x12   :  { %188 = dma.done.wait [#allocation3], 256  }
  0x13   :  { %189 = vsyncadd [#allocation3], 4294967040  ;;  %v221_v0 = vld [vmem:[#allocation2] sm:$0xff]  ;;  %v223_v1 = vld [vmem:[#allocation2 + $0x8] sm:$0xff]  ;;  %s195_s0 = smov [#allocation5]  }
  0x14   :  { %v25_v2 = vmul.f32 255.0, %v221_v0  ;;  %v26_v3 = vmul.f32 255.0, %v223_v1  ;;  %s124_s20 = sshll.u32 %s195_s0, 4  ;;  %s125_s20 = int_to_ptr.vmem [resolvable:$true] %s124_s20 }
  0x15   :  { %s166_s21 = scalar_lea.vmem %s125_s20, 256  ;;  %p171_p9 = scmp.lt.s32.totalorder %s125_s20, %s125_s20 }
  0x16   :  { %v27_v4 = vadd.f32 0.5, %v25_v2  ;;  %v28_v5 = vadd.f32 0.5, %v26_v3  ;;  %p167_p8 = scmp.ne.s32.totalorder %s125_s20, %s166_s21  ;;  %p172_p10 = scmp.lt.s32.totalorder %s166_s21, %s166_s21 }
  0x18   :  { %v29_v6 = vfloor.f32 %v27_v4  ;;  %v30_v7 = vfloor.f32 %v28_v5  ;;  %p173_p11 = por %p172_p10, %p171_p9 }
  0x1a   :  { %v31_v8 = vsub.f32 %v25_v2, %v29_v6  ;;  %v32_v9 = vsub.f32 %v26_v3, %v30_v7  ;;  %p174_p12 = pnand %p173_p11, %p167_p8 }
  0x1c   :  { %v33_v10 = vmul.f32 %v31_v8, %v31_v8  ;;  %v34_v11 = vmul.f32 %v32_v9, %v32_v9  ;;  %v73_v38 = vand.u32 2147483647, %v31_v8  ;;  %v74_v39 = vand.u32 2147483647, %v32_v9 }
  0x1e   :  { %v35_v12 = vmul.f32 33.548355, %v33_v10  ;;  %v36_v13 = vmul.f32 33.548355, %v34_v11  ;;  %vm75_vm4 = vcmp.le.f32.partialorder %v73_v38, 0.25  ;;  %vm76_vm5 = vcmp.le.f32.partialorder %v74_v39, 0.25 }
  0x20   :  { %v37_v14 = vadd.f32 -74.90942, %v35_v12  ;;  %v38_v15 = vadd.f32 -74.90942, %v36_v13 }
  0x22   :  { %v39_v16 = vmul.f32 %v37_v14, %v33_v10  ;;  %v40_v17 = vmul.f32 %v38_v15, %v34_v11 }
  0x24   :  { %v41_v18 = vadd.f32 81.44771, %v39_v16  ;;  %v42_v19 = vadd.f32 81.44771, %v40_v17 }
  0x26   :  { %v43_v20 = vmul.f32 %v41_v18, %v33_v10  ;;  %v44_v21 = vmul.f32 %v42_v19, %v34_v11 }
  0x28   :  { %v45_v22 = vadd.f32 -41.33683, %v43_v20  ;;  %v46_v23 = vadd.f32 -41.33683, %v44_v21 }
  0x2a   :  { %v47_v24 = vmul.f32 %v45_v22, %v33_v10  ;;  %v48_v25 = vmul.f32 %v46_v23, %v34_v11 }
  0x2c   :  { %v49_v26 = vadd.f32 6.283161, %v47_v24  ;;  %v50_v27 = vadd.f32 6.283161, %v48_v25 }
  0x2e   :  { %v51_v28 = vmul.f32 %v49_v26, %v31_v8  ;;  %v52_v29 = vmul.f32 %v50_v27, %v32_v9 }
  0x30   :  { %v53_v30 = vmul.f32 %v51_v28, %v51_v28  ;;  %v54_v31 = vmul.f32 %v52_v29, %v52_v29  ;;  %v83_v54 = vmul.f32 -0.0012482741, %v51_v28  ;;  %v84_v56 = vmul.f32 -0.0012482741, %v52_v29 }
  0x32   :  { %v55_v32 = vsub.f32 1.0, %v53_v30  ;;  %v56_v33 = vsub.f32 1.0, %v54_v31 }
  0x34   :  { %v57_v34 = vmax.f32 %v55_v32, 0.0  ;;  %v58_v35 = vmax.f32 %v56_v33, 0.0 }
  0x36   :  { %140 = vrsqrt.f32 %v57_v34  ;;  %vm61_vm0 = vcmp.eq.f32.partialorder %v57_v34, inf  ;;  %v64_v37 = vand.u32 2147483648, %v57_v34  ;;  %vm63_vm1 = vcmp.eq.f32.partialorder %v57_v34, 0.0 }
  0x37   :  { %142 = vrsqrt.f32 %v58_v35  ;;  %vm68_vm2 = vcmp.eq.f32.partialorder %v58_v35, inf  ;;  %v71_v42 = vand.u32 2147483648, %v58_v35  ;;  %vm70_vm3 = vcmp.eq.f32.partialorder %v58_v35, 0.0 }
  0x40   :  { %v141_v36 = vpop.eup %140 }
  0x41   :  { %v143_v40 = vpop.eup %142  ;;  %v60_v41 = vmul.f32 %v141_v36, %v57_v34 }
  0x42   :  { %v67_v43 = vmul.f32 %v143_v40, %v58_v35 }
  0x43   :  { %v62_v44 = vsel %vm61_vm0, %v57_v34, %v60_v41 }
  0x44   :  { %v65_v45 = vsel %vm63_vm1, %v64_v37, %v62_v44  ;;  %v69_v46 = vsel %vm68_vm2, %v58_v35, %v67_v43 }
  0x45   :  { %v77_v47 = vsub.f32 0.0, %v65_v45  ;;  %v72_v48 = vsel %vm70_vm3, %v71_v42, %v69_v46 }
  0x46   :  { %v78_v49 = vsub.f32 0.0, %v72_v48 }
  0x47   :  { %v79_v50 = vsel %vm75_vm4, %v65_v45, %v77_v47 }
  0x48   :  { %v81_v51 = vmul.f32 2.0, %v79_v50  ;;  %v80_v52 = vsel %vm76_vm5, %v72_v48, %v78_v49 }
  0x49   :  { %v82_v53 = vmul.f32 2.0, %v80_v52 }
  0x4a   :  { %v85_v55 = vmul.f32 %v81_v51, %v51_v28 }
  0x4b   :  { %v86_v57 = vmul.f32 %v82_v53, %v52_v29 }
  0x4c   :  { %v87_v58 = vmul.f32 0.00062413706, %v85_v55  ;;  %v91_v59 = vmul.f32 %v85_v55, %v81_v51 }
  0x4d   :  { %v88_v60 = vmul.f32 0.00062413706, %v86_v57  ;;  %v92_v61 = vmul.f32 %v86_v57, %v82_v53 }
  0x4e   :  { %v89_v62 = vadd.f32 %v87_v58, %v83_v54  ;;  %v93_v63 = vsub.f32 %v91_v59, %v51_v28 }
  0x4f   :  { %v90_v2 = vadd.f32 %v88_v60, %v84_v56  ;;  %v94_v3 = vsub.f32 %v92_v61, %v52_v29 }
  0x50   :  { %v95_v4 = vmul.f32 -0.00041609135, %v93_v63  ;;  %v99_v5 = vmul.f32 %v93_v63, %v81_v51 }
  0x51   :  { %v96_v6 = vmul.f32 -0.00041609135, %v94_v3  ;;  %v100_v7 = vmul.f32 %v94_v3, %v82_v53 }
  0x52   :  { %v97_v8 = vadd.f32 %v95_v4, %v89_v62  ;;  %v101_v9 = vsub.f32 %v99_v5, %v85_v55 }
  0x53   :  { %v98_v10 = vadd.f32 %v96_v6, %v90_v2  ;;  %v102_v11 = vsub.f32 %v100_v7, %v86_v57 }
  0x54   :  { %v103_v12 = vmul.f32 0.00031206853, %v101_v9  ;;  %v107_v13 = vmul.f32 %v101_v9, %v81_v51 }
  0x55   :  { %v104_v14 = vmul.f32 0.00031206853, %v102_v11  ;;  %v108_v15 = vmul.f32 %v102_v11, %v82_v53 }
  0x56   :  { %v105_v16 = vadd.f32 %v103_v12, %v97_v8  ;;  %v109_v17 = vsub.f32 %v107_v13, %v93_v63 }
  0x57   :  { %v106_v18 = vadd.f32 %v104_v14, %v98_v10  ;;  %v110_v19 = vsub.f32 %v108_v15, %v94_v3 }
  0x58   :  { %v111_v20 = vmul.f32 -0.0002496548, %v109_v17 }
  0x59   :  { %v112_v21 = vmul.f32 -0.0002496548, %v110_v19 }
  0x5a   :  { %v113_v22 = vadd.f32 %v111_v20, %v105_v16 }
  0x5b   :  { %v114_v23 = vadd.f32 %v112_v21, %v106_v18 }
  0x5c   :  { %v115_v24 = vadd.f32 %v113_v22, %v221_v0 }
  0x5d   :  { %v116_v25 = vadd.f32 %v114_v23, %v223_v1 }
  0x5e   :  { %117 = vst [vmem:[#allocation5] sm:$0xff] %v115_v24 }
  0x5f   :  { %118 = vst [vmem:[#allocation5 + $0x8] sm:$0xff] %v116_v25 }
  0x60   :  { %177 = shalt.err (!%p174_p12)
}
  0x61   :  { %s178_s24 = scalar_lea.hbm %s245_s1, 256 }
  0x62   :  { %p179_p13 = scmp.ne.s32.totalorder %s245_s1, %s178_s24  ;;  %p182_p0 = scmp.lt.u32.totalorder %s178_s24, %s245_s1 }
  0x64   :  { %p184_p1 = pnand %p182_p0, %p179_p13 }
  0x66   :  { %187 = shalt.err (!%p184_p1)
}
  0x67   :  { %130 = dma.vmem_to_hbm [thread:$0]  %s125_s20, 256, %s245_s1, [#allocation4], %s193_s16, %s193_s16, %s194_s17  }
  0x68   :  { %190 = dma.done.wait [#allocation4], 256  }
  0x69   :  { %191 = vsyncadd [#allocation4], 4294967040 }
  0x6a   :  { %134 = vsyncpa [#allocation3], 1 }
  0x6b   :  { %135 = vsyncpa [#allocation4], 1 }

</bundles_post_ra>
